<compile_context>
chip_gen: v7x
topology: tpu7x:2x2x1
jax: 0.10.0
libtpu: 0.0.40
codegen_flags: <defaults>
</compile_context>

<pallas_src>
import functools

import jax
import jax.numpy as jnp
from jax.experimental import pallas as pl
from jax.experimental.pallas import tpu as pltpu

LANES = 128
MAX_BLOCK_ROWS = 2048  # (2048, 128) f32 block = 1 MiB; 2 inputs x 2 bufs + 2 acc ~ 6 MiB VMEM


def _round_up(x, m):
    return (x + m - 1) // m * m


def _loss_reduce_kernel(p_ref, t_ref, sq_ref, ab_ref, sq_acc, ab_acc,
                        *, rows, block_rows, blocks_per_core, need_mask):
    c = pl.program_id(0)  # core-parallel axis (megacore on v7x)
    i = pl.program_id(1)  # reduction axis over row-blocks

    @pl.when(i == 0)
    def _():
        sq_acc[...] = jnp.zeros_like(sq_acc)
        ab_acc[...] = jnp.zeros_like(ab_acc)

    d = p_ref[...].astype(jnp.float32) - t_ref[...].astype(jnp.float32)

    if need_mask:
        # Logical (unclamped) first row of this block; rows >= `rows` come
        # from boundary padding / clamped phantom blocks and must not count.
        row0 = (c * blocks_per_core + i) * block_rows
        row_ids = row0 + jax.lax.broadcasted_iota(
            jnp.int32, (block_rows, LANES), 0)
        d = jnp.where(row_ids < rows, d, 0.0)

    # Elementwise accumulate on the VPU (free slack in a mem-bound kernel).
    sq_acc[...] += d * d
    ab_acc[...] += jnp.abs(d)

    # Single expensive reduction, once per core.
    @pl.when(i == pl.num_programs(1) - 1)
    def _():
        sq_ref[...] = jnp.sum(sq_acc[...]).reshape(1, 1, 1)
        ab_ref[...] = jnp.sum(ab_acc[...]).reshape(1, 1, 1)


@jax.jit
def _fused_loss_sums(preds, target):
    """Returns (sum((p-t)^2), sum(|p-t|)) as f32 scalars in one fused pass."""
    n = preds.size
    p = preds.reshape(-1)
    t = target.reshape(-1)

    rows = n // LANES
    main = rows * LANES

    sq_sum = jnp.float32(0.0)
    ab_sum = jnp.float32(0.0)

    # Sub-row tail (< 128 elements): handled with plain jnp.  Only triggers
    # when n % 128 != 0 (then the slice may copy; the common case is free).
    if main != n:
        dt = p[main:].astype(jnp.float32) - t[main:].astype(jnp.float32)
        sq_sum = sq_sum + jnp.sum(dt * dt)
        ab_sum = ab_sum + jnp.sum(jnp.abs(dt))

    if rows == 0:
        return sq_sum, ab_sum

    p2 = p[:main].reshape(rows, LANES)   # pure reshape when n % 128 == 0
    t2 = t[:main].reshape(rows, LANES)

    block_rows = min(MAX_BLOCK_ROWS, _round_up(rows, 8))
    num_blocks = pl.cdiv(rows, block_rows)
    # 2-way split across TensorCores (v7x megacore); serial & harmless on 1-TC chips.
    num_cores = 2 if num_blocks > 1 else 1
    blocks_per_core = pl.cdiv(num_blocks, num_cores)
    need_mask = (rows % block_rows != 0) or (num_cores * blocks_per_core != num_blocks)

    def in_map(c, i):
        # Clamp so a phantom block (odd split) never DMAs fully out of range;
        # its contribution is zeroed by the in-kernel row mask.
        return (jnp.minimum(c * blocks_per_core + i, num_blocks - 1), 0)

    kernel = functools.partial(
        _loss_reduce_kernel, rows=rows, block_rows=block_rows,
        blocks_per_core=blocks_per_core, need_mask=need_mask)

    bytes_per_el = preds.dtype.itemsize + target.dtype.itemsize
    cost = pl.CostEstimate(
        flops=5 * main, transcendentals=0,
        bytes_accessed=main * bytes_per_el + 8 * num_cores)

    sq_part, ab_part = pl.pallas_call(
        kernel,
        out_shape=(
            jax.ShapeDtypeStruct((num_cores, 1, 1), jnp.float32),
            jax.ShapeDtypeStruct((num_cores, 1, 1), jnp.float32),
        ),
        grid_spec=pltpu.PrefetchScalarGridSpec(
            num_scalar_prefetch=0,
            grid=(num_cores, blocks_per_core),
            in_specs=[
                pl.BlockSpec((block_rows, LANES), in_map),
                pl.BlockSpec((block_rows, LANES), in_map),
            ],
            out_specs=(
                pl.BlockSpec((1, 1, 1), lambda c, i: (c, 0, 0)),
                pl.BlockSpec((1, 1, 1), lambda c, i: (c, 0, 0)),
            ),
            scratch_shapes=[
                pltpu.VMEM((block_rows, LANES), jnp.float32),
                pltpu.VMEM((block_rows, LANES), jnp.float32),
            ],
        ),
        compiler_params=pltpu.CompilerParams(
            dimension_semantics=("parallel", "arbitrary"),
        ),
        cost_estimate=cost,
    )(p2, t2)

    return sq_sum + jnp.sum(sq_part), ab_sum + jnp.sum(ab_part)


class LossFactoryPallas:
    """JAX/Pallas port of Loss_factory.

    Supported loss names: 'mse' (mean squared error), 'l1' (mean absolute
    error).  The original module eval()s arbitrary loss-function names from
    the config string; here the supported set is fixed in-script.
    """

    def __init__(self, loss_str: str):
        self.loss_collection = {}
        for loss_im in loss_str.split(','):
            tags = loss_im.split('_')
            self.loss_collection[tags[0]] = (
                float(tags[1]) if len(tags) == 2 else 1.0
            )
        for name in self.loss_collection:
            if name not in ('mse', 'l1'):
                # TODO(synk): only mse/l1 losses are implemented in the Pallas kernel.
                raise NotImplementedError(f"loss '{name}' not supported")

    def __call__(self, preds, target):
        n = preds.size
        sq_sum, ab_sum = _fused_loss_sums(preds, target)
        per_loss = {
            'mse': sq_sum / n,  # matches F.mse_loss(reduction='mean')
            'l1': ab_sum / n,   # matches F.l1_loss(reduction='mean')
        }
        loss_sum = jnp.float32(0.0)
        ldict = {}
        for name, weight in self.loss_collection.items():
            loss = per_loss[name] * weight
            ldict[name] = loss
            loss_sum = loss_sum + loss
        return loss_sum, ldict


if __name__ == "__main__":
    key = jax.random.PRNGKey(0)
    kp, kt = jax.random.split(key)
    # NCHW inputs, as in the PyTorch model ecosystem this loss serves.
    preds = jax.random.normal(kp, (2, 4, 16, 16), dtype=jnp.float32)
    target = jax.random.normal(kt, (2, 4, 16, 16), dtype=jnp.float32)

    factory = LossFactoryPallas("mse_1.0,l1_0.5")
    loss_sum, ldict = factory(preds, target)
    loss_sum = jax.block_until_ready(loss_sum)
    for v in ldict.values():
        jax.block_until_ready(v)

    # Cross-check against plain-JAX reference.
    ref_mse = jnp.mean((preds - target) ** 2) * 1.0
    ref_l1 = jnp.mean(jnp.abs(preds - target)) * 0.5
    ref_sum = ref_mse + ref_l1
    assert jnp.allclose(loss_sum, ref_sum, rtol=1e-5, atol=1e-6)
    assert jnp.allclose(ldict['mse'], ref_mse, rtol=1e-5, atol=1e-6)
    assert jnp.allclose(ldict['l1'], ref_l1, rtol=1e-5, atol=1e-6)

    print("KERNEL_OK")
</pallas_src>

<mosaic_0001>
module attributes {stable_mosaic.version = 11 : i64} {
  func.func @_loss_reduce_kernel(%arg0: i32, %arg1: i32, %arg2: memref<16x128xf32, #tpu.memory_space<vmem>>, %arg3: memref<16x128xf32, #tpu.memory_space<vmem>>, %arg4: memref<1x1x1xf32, #tpu.memory_space<vmem>>, %arg5: memref<1x1x1xf32, #tpu.memory_space<vmem>>, %arg6: memref<16x128xf32, #tpu.memory_space<vmem>>, %arg7: memref<16x128xf32, #tpu.memory_space<vmem>>) attributes {dimension_semantics = [#tpu.dimension_semantics<parallel>, #tpu.dimension_semantics<arbitrary>], iteration_bounds = array<i64: 1, 1>, scalar_prefetch = 0 : i64, scratch_operands = 2 : i64, tpu.core_type = #tpu.core_type<tc>, window_params = [{transform_indices = @transform_0, window_bounds = array<i64: 16, 128>}, {transform_indices = @transform_1, window_bounds = array<i64: 16, 128>}, {transform_indices = @transform_2, window_bounds = array<i64: 1, 1, 1>}, {transform_indices = @transform_3, window_bounds = array<i64: 1, 1, 1>}]} {
    %c0_i32 = arith.constant 0 : i32
    %0 = arith.cmpi eq, %arg1, %c0_i32 : i32
    %1 = arith.extui %0 : i1 to i32
    %c0_i32_0 = arith.constant 0 : i32
    %2 = arith.cmpi ne, %1, %c0_i32_0 : i32
    scf.if %2 {
      %cst = arith.constant 0.000000e+00 : f32
      %17 = vector.broadcast %cst : f32 to vector<16x128xf32>
      %c0_14 = arith.constant 0 : index
      %c0_15 = arith.constant 0 : index
      %18 = vector.load %arg6[%c0_14, %c0_15] : memref<16x128xf32, #tpu.memory_space<vmem>>, vector<16x128xf32>
      tpu.vector_store %arg6[%c0_14, %c0_15], %17 {strides = array<i32>} : memref<16x128xf32, #tpu.memory_space<vmem>>, vector<16x128xf32>,
      %cst_16 = arith.constant 0.000000e+00 : f32
      %19 = vector.broadcast %cst_16 : f32 to vector<16x128xf32>
      %c0_17 = arith.constant 0 : index
      %c0_18 = arith.constant 0 : index
      %20 = vector.load %arg7[%c0_17, %c0_18] : memref<16x128xf32, #tpu.memory_space<vmem>>, vector<16x128xf32>
      tpu.vector_store %arg7[%c0_17, %c0_18], %19 {strides = array<i32>} : memref<16x128xf32, #tpu.memory_space<vmem>>, vector<16x128xf32>,
    } else {
    }
    %c0 = arith.constant 0 : index
    %c0_1 = arith.constant 0 : index
    %3 = vector.load %arg2[%c0, %c0_1] : memref<16x128xf32, #tpu.memory_space<vmem>>, vector<16x128xf32>
    %c0_2 = arith.constant 0 : index
    %c0_3 = arith.constant 0 : index
    %4 = vector.load %arg3[%c0_2, %c0_3] : memref<16x128xf32, #tpu.memory_space<vmem>>, vector<16x128xf32>
    %5 = arith.subf %3, %4 : vector<16x128xf32>
    %c0_4 = arith.constant 0 : index
    %c0_5 = arith.constant 0 : index
    %6 = vector.load %arg6[%c0_4, %c0_5] : memref<16x128xf32, #tpu.memory_space<vmem>>, vector<16x128xf32>
    %7 = arith.mulf %5, %5 : vector<16x128xf32>
    %8 = arith.addf %6, %7 : vector<16x128xf32>
    %c0_6 = arith.constant 0 : index
    %c0_7 = arith.constant 0 : index
    %9 = vector.load %arg6[%c0_6, %c0_7] : memref<16x128xf32, #tpu.memory_space<vmem>>, vector<16x128xf32>
    tpu.vector_store %arg6[%c0_6, %c0_7], %8 {strides = array<i32>} : memref<16x128xf32, #tpu.memory_space<vmem>>, vector<16x128xf32>,
    %c0_8 = arith.constant 0 : index
    %c0_9 = arith.constant 0 : index
    %10 = vector.load %arg7[%c0_8, %c0_9] : memref<16x128xf32, #tpu.memory_space<vmem>>, vector<16x128xf32>
    %11 = math.absf %5 : vector<16x128xf32>
    %12 = arith.addf %10, %11 : vector<16x128xf32>
    %c0_10 = arith.constant 0 : index
    %c0_11 = arith.constant 0 : index
    %13 = vector.load %arg7[%c0_10, %c0_11] : memref<16x128xf32, #tpu.memory_space<vmem>>, vector<16x128xf32>
    tpu.vector_store %arg7[%c0_10, %c0_11], %12 {strides = array<i32>} : memref<16x128xf32, #tpu.memory_space<vmem>>, vector<16x128xf32>,
    %c0_i32_12 = arith.constant 0 : i32
    %14 = arith.cmpi eq, %arg1, %c0_i32_12 : i32
    %15 = arith.extui %14 : i1 to i32
    %c0_i32_13 = arith.constant 0 : i32
    %16 = arith.cmpi ne, %15, %c0_i32_13 : i32
    scf.if %16 {
      %c0_14 = arith.constant 0 : index
      %c0_15 = arith.constant 0 : index
      %17 = vector.load %arg6[%c0_14, %c0_15] : memref<16x128xf32, #tpu.memory_space<vmem>>, vector<16x128xf32>
      %18 = vector.shape_cast %17 : vector<16x128xf32> to vector<1x16x128xf32>
      %cst = arith.constant dense<0.000000e+00> : vector<1xf32>
      %19 = vector.multi_reduction <add>, %18, %cst [1, 2] : vector<1x16x128xf32> to vector<1xf32>
      %20 = vector.shape_cast %19 : vector<1xf32> to vector<1x1x1xf32>
      %21 = vector.extract %20[0, 0, 0] : f32 from vector<1x1x1xf32>
      %22 = vector.broadcast %21 : f32 to vector<1x1x1xf32>
      %c0_16 = arith.constant 0 : index
      %c0_17 = arith.constant 0 : index
      %c0_18 = arith.constant 0 : index
      %23 = vector.load %arg4[%c0_16, %c0_17, %c0_18] : memref<1x1x1xf32, #tpu.memory_space<vmem>>, vector<1x1x1xf32>
      tpu.vector_store %arg4[%c0_16, %c0_17, %c0_18], %22 {strides = array<i32>} : memref<1x1x1xf32, #tpu.memory_space<vmem>>, vector<1x1x1xf32>,
      %c0_19 = arith.constant 0 : index
      %c0_20 = arith.constant 0 : index
      %24 = vector.load %arg7[%c0_19, %c0_20] : memref<16x128xf32, #tpu.memory_space<vmem>>, vector<16x128xf32>
      %25 = vector.shape_cast %24 : vector<16x128xf32> to vector<1x16x128xf32>
      %cst_21 = arith.constant dense<0.000000e+00> : vector<1xf32>
      %26 = vector.multi_reduction <add>, %25, %cst_21 [1, 2] : vector<1x16x128xf32> to vector<1xf32>
      %27 = vector.shape_cast %26 : vector<1xf32> to vector<1x1x1xf32>
      %28 = vector.extract %27[0, 0, 0] : f32 from vector<1x1x1xf32>
      %29 = vector.broadcast %28 : f32 to vector<1x1x1xf32>
      %c0_22 = arith.constant 0 : index
      %c0_23 = arith.constant 0 : index
      %c0_24 = arith.constant 0 : index
      %30 = vector.load %arg5[%c0_22, %c0_23, %c0_24] : memref<1x1x1xf32, #tpu.memory_space<vmem>>, vector<1x1x1xf32>
      tpu.vector_store %arg5[%c0_22, %c0_23, %c0_24], %29 {strides = array<i32>} : memref<1x1x1xf32, #tpu.memory_space<vmem>>, vector<1x1x1xf32>,
    } else {
    }
    return
  }
  func.func @transform_0(%arg0: i32, %arg1: i32) -> (i32, i32) {
    %c1_i32 = arith.constant 1 : i32
    %0 = arith.muli %arg0, %c1_i32 : i32
    %1 = arith.addi %0, %arg1 : i32
    %c0_i32 = arith.constant 0 : i32
    %2 = arith.minsi %1, %c0_i32 : i32
    %c0_i32_0 = arith.constant 0 : i32
    %c0_i32_1 = arith.constant 0 : i32
    return %2, %c0_i32_0 : i32, i32
  }
  func.func @transform_1(%arg0: i32, %arg1: i32) -> (i32, i32) {
    %c1_i32 = arith.constant 1 : i32
    %0 = arith.muli %arg0, %c1_i32 : i32
    %1 = arith.addi %0, %arg1 : i32
    %c0_i32 = arith.constant 0 : i32
    %2 = arith.minsi %1, %c0_i32 : i32
    %c0_i32_0 = arith.constant 0 : i32
    %c0_i32_1 = arith.constant 0 : i32
    return %2, %c0_i32_0 : i32, i32
  }
  func.func @transform_2(%arg0: i32, %arg1: i32) -> (i32, i32, i32) {
    %c0_i32 = arith.constant 0 : i32
    %c0_i32_0 = arith.constant 0 : i32
    %c0_i32_1 = arith.constant 0 : i32
    return %arg0, %c0_i32, %c0_i32_0 : i32, i32, i32
  }
  func.func @transform_3(%arg0: i32, %arg1: i32) -> (i32, i32, i32) {
    %c0_i32 = arith.constant 0 : i32
    %c0_i32_0 = arith.constant 0 : i32
    %c0_i32_1 = arith.constant 0 : i32
    return %arg0, %c0_i32, %c0_i32_0 : i32, i32, i32
  }
}

</mosaic_0001>

<bundles_post_ra>
// kernel: _fused_loss_sums.1
= control target key start
LH: loop header
LB: loop body
LE: loop exit
PB: predicated region body
PF: predicated region fallthrough
CT: control target
= control target key end

     0   :  { %9 = vsyncpa [#allocation5], 0  ;;  %s295_s0 = inlined_call_operand.vmem [shape: f32[16,128], index: 0, kind: input, shape index: {}]   ;;  %s296_s1 = inlined_call_operand.vmem [shape: f32[16,128], index: 1, kind: input, shape index: {}]   ;;  %s297_s2 = inlined_call_operand.hbm [shape: f32[1,1,1], index: 2, kind: output, shape index: {0}]   ;;  %s298_s3 = inlined_call_operand.hbm [shape: f32[1,1,1], index: 3, kind: output, shape index: {1}]  }
   0x1   :  { %v87_v0 = vld [vmem:[%s295_s0] sm:$0xff]  ;;  %v88_v1 = vld [vmem:[%s295_s0 + $0x8] sm:$0xff] }
   0x2   :  { %v89_v2 = vld [vmem:[%s296_s1] sm:$0xff]  ;;  %v90_v3 = vld [vmem:[%s296_s1 + $0x8] sm:$0xff] }
   0x3   :  { %v91_v4 = vsub.f32 %v87_v0, %v89_v2 }
   0x4   :  { %10 = vsyncpa [#allocation7], 0  ;;  %v92_v5 = vsub.f32 %v88_v1, %v90_v3  ;;  %s235_s0 = smov [#allocation4]   ;;  %vm125_vm0 = vcmask 0   ;;  %s236_s21 = smov [#allocation6]  }
   0x5   :  { %v95_v6 = vmul.f32 %v91_v4, %v91_v4  ;;  %v103_v8 = vand.u32 2147483647, %v91_v4  ;;  %s147_s1 = sshll.u32 %s235_s0, 4  ;;  %s157_s22 = sshll.u32 %s236_s21, 4  ;;  %s148_s1 = int_to_ptr.vmem [resolvable:$true] %s147_s1  ;;  %s158_s22 = int_to_ptr.vmem [resolvable:$true] %s157_s22 }
   0x6   :  { %v96_v7 = vmul.f32 %v92_v5, %v92_v5  ;;  %v104_v9 = vand.u32 2147483647, %v92_v5  ;;  %s187_s23 = scalar_lea.vmem %s148_s1, 16  ;;  %s191_s24 = scalar_lea.vmem %s148_s1, 32 }
   0x7   :  { %p188_p0 = scmp.ne.s32.totalorder %s148_s1, %s187_s23  ;;  %p192_p1 = scmp.lt.s32.totalorder %s148_s1, %s148_s1 }
   0x8   :  { %v114_v10 = vadd.f32 %v96_v7, %v95_v6  ;;  %v129_v11 = vadd.f32 %v104_v9, %v103_v8  ;;  %p193_p2 = scmp.lt.s32.totalorder %s191_s24, %s187_s23 }
   0xa   :  { %115 = vadd.xlane.f32.xlu0 %v114_v10  ;;  %p194_p3 = por %p193_p2, %p192_p1 }
   0xc   :  { %p195_p4 = pnand %p194_p3, %p188_p0 }
   0xe   :  { %130 = vadd.xlane.f32.xlu0 %v129_v11 }
  0x97   :  { %v116_v12 = vpop.xlane.xlu0 %115 }
  0x98   :  { %v117_v13 = vrot.slane %v116_v12, 4 }
  0x9a   :  { %v118_v14 = vadd.f32 %v117_v13, %v116_v12 }
  0x9b   :  { %v131_v15 = vpop.xlane.xlu0 %130 }
  0x9c   :  { %v119_v16 = vrot.slane %v118_v14, 2  ;;  %v132_v17 = vrot.slane %v131_v15, 4 }
  0x9e   :  { %v133_v18 = vadd.f32 %v132_v17, %v131_v15  ;;  %v120_v19 = vadd.f32 %v119_v16, %v118_v14 }
  0xa0   :  { %v134_v20 = vrot.slane %v133_v18, 2  ;;  %v121_v21 = vrot.slane %v120_v19, 1 }
  0xa2   :  { %v135_v22 = vadd.f32 %v134_v20, %v133_v18  ;;  %v122_v23 = vadd.f32 %v121_v21, %v120_v19 }
  0xa4   :  { %181 = vpush %v122_v23  ;;  %v136_v24 = vrot.slane %v135_v22, 1 }
  0xa6   :  { %v137_v25 = vadd.f32 %v136_v24, %v135_v22 }
  0xa8   :  { %183 = vpush %v137_v25 }
  0xd5   :  { %s182_s20 = spop %181 }
  0xd6   :  { %v124_v26 = vstv %s182_s20 }
  0xd7   :  { %126 = vst.msk [vmem:[#allocation4] sm:$0x1] %vm125_vm0, %v124_v26 }
  0xd8   :  { %198 = shalt.err (!%p195_p4)
}
  0xd9   :  { %s199_s27 = scalar_lea.hbm %s297_s2, 16 }
  0xda   :  { %p200_p5 = scmp.ne.s32.totalorder %s297_s2, %s199_s27  ;;  %p203_p6 = scmp.lt.u32.totalorder %s199_s27, %s297_s2 }
  0xdc   :  { %p205_p7 = pnand %p203_p6, %p200_p5 }
  0xde   :  { %208 = shalt.err (!%p205_p7)
}
  0xdf   :  { %150 = dma.vmem_to_hbm [thread:$0]  %s148_s1, 16, %s297_s2, [#allocation5]  }
  0xe0   :  { %s184_s7 = spop %183  ;;  %s209_s8 = scalar_lea.vmem %s158_s22, 16 }
  0xe1   :  { %v139_v27 = vstv %s184_s7  ;;  %p210_p8 = scmp.ne.s32.totalorder %s158_s22, %s209_s8  ;;  %s213_s9 = scalar_lea.vmem %s158_s22, 32 }
  0xe2   :  { %140 = vst.msk [vmem:[#allocation6] sm:$0x1] %vm125_vm0, %v139_v27  ;;  %p214_p9 = scmp.lt.s32.totalorder %s158_s22, %s158_s22  ;;  %p215_p10 = scmp.lt.s32.totalorder %s213_s9, %s209_s8 }
  0xe4   :  { %p216_p11 = por %p215_p10, %p214_p9 }
  0xe6   :  { %p217_p12 = pnand %p216_p11, %p210_p8 }
  0xe8   :  { %220 = shalt.err (!%p217_p12)
}
  0xe9   :  { %s221_s12 = scalar_lea.hbm %s298_s3, 16 }
  0xea   :  { %p222_p13 = scmp.ne.s32.totalorder %s298_s3, %s221_s12  ;;  %p225_p0 = scmp.lt.u32.totalorder %s221_s12, %s298_s3 }
  0xec   :  { %p227_p1 = pnand %p225_p0, %p222_p13 }
  0xee   :  { %230 = shalt.err (!%p227_p1)
}
  0xef   :  { %160 = dma.vmem_to_hbm [thread:$0]  %s158_s22, 16, %s298_s3, [#allocation7]  }
  0xf0   :  { %231 = dma.done.wait [#allocation5], 16  }
  0xf1   :  { %232 = vsyncadd [#allocation5], 4294967280 }
  0xf2   :  { %233 = dma.done.wait [#allocation7], 16  }
  0xf3   :  { %234 = vsyncadd [#allocation7], 4294967280 }
  0xf4   :  { %167 = vsyncpa [#allocation5], 1 }
  0xf5   :  { %168 = vsyncpa [#allocation7], 1 }

</bundles_post_ra>
